<compile_context>
chip_gen: v5e
topology: v5e:2x2
jax: 0.10.0
libtpu: 0.0.40
codegen_flags: <defaults>
</compile_context>

<pallas_src>
import functools

import jax
import jax.numpy as jnp
from jax.experimental import pallas as pl
from jax.experimental.pallas import tpu as pltpu

_LANE = 128
_MIB = 1024 * 1024
# Budget for the "everything resident" fused path: comfortably under the
# 32 MiB scoped-VMEM default of v6e/v7x and leaves headroom on v5e.
_FUSED_VMEM_BUDGET = 20 * _MIB


def _round_up(v, m):
    return (v + m - 1) // m * m


def _pad2(x, shape):
    return jnp.pad(x, ((0, shape[0] - x.shape[0]), (0, shape[1] - x.shape[1])))


# ----------------------------------------------------------------------------
# Fused path: both GCN layers in a single pallas_call, all operands resident
# in VMEM (no grid), A_hat streamed from HBM exactly once, H stays on-chip.
# ----------------------------------------------------------------------------
def _fused_gnn_kernel(a_ref, x_ref, w1_ref, b1_ref, w2_ref, b2_ref, o_ref):
    # Layer 1 (transform-then-aggregate): H = relu(A @ (X @ W1) + b1)
    xw1 = jnp.dot(x_ref[...], w1_ref[...], preferred_element_type=jnp.float32)
    h = jnp.dot(a_ref[...], xw1.astype(jnp.bfloat16),
                preferred_element_type=jnp.float32)
    h = jnp.maximum(h + b1_ref[...], 0.0)
    # Layer 2: out = A @ (H @ W2) + b2
    hw2 = jnp.dot(h.astype(jnp.bfloat16), w2_ref[...],
                  preferred_element_type=jnp.float32)
    out = jnp.dot(a_ref[...], hw2.astype(jnp.bfloat16),
                  preferred_element_type=jnp.float32)
    o_ref[...] = (out + b2_ref[...]).astype(o_ref.dtype)


def _fused_vmem_bytes(n, fin, hid, fout):
    operands = (n * n * 2 + n * fin * 2 + fin * hid * 2 + hid * 4
                + hid * fout * 2 + fout * 4 + n * fout * 4)
    # rough allowance for in-kernel f32/bf16 intermediates (XW1, H, HW2, out)
    temps = n * (hid * 10 + fout * 10)
    return operands + temps


def _fused_gnn(a, x, w1, b1, w2, b2):
    n, fin = x.shape
    hid = w1.shape[1]
    fout = w2.shape[1]
    flops = 2 * n * (fin * hid + n * hid + hid * fout + n * fout)
    bytes_accessed = (a.size * 2 + x.size * 2 + w1.size * 2 + b1.size * 4
                      + w2.size * 2 + b2.size * 4 + n * fout * 4)
    vmem_need = _fused_vmem_bytes(n, fin, hid, fout)
    return pl.pallas_call(
        _fused_gnn_kernel,
        out_shape=jax.ShapeDtypeStruct((n, fout), jnp.float32),
        compiler_params=pltpu.CompilerParams(
            vmem_limit_bytes=int(min(2 * vmem_need + 4 * _MIB, 32 * _MIB))),
        cost_estimate=pl.CostEstimate(flops=flops, transcendentals=0,
                                      bytes_accessed=bytes_accessed),
    )(a, x, w1, b1, w2, b2)


# ----------------------------------------------------------------------------
# Tiled fallback path for graphs too large for VMEM residency.
# ----------------------------------------------------------------------------
def _transform_kernel(x_ref, w_ref, o_ref):
    o_ref[...] = jnp.dot(x_ref[...], w_ref[...],
                         preferred_element_type=jnp.float32).astype(o_ref.dtype)


def _transform(x, w, tm):
    """XW = X @ W, tiled over rows; W stays resident. Returns bf16 (n, fout)."""
    n, fin = x.shape
    fout = w.shape[1]
    return pl.pallas_call(
        _transform_kernel,
        out_shape=jax.ShapeDtypeStruct((n, fout), jnp.bfloat16),
        grid_spec=pltpu.PrefetchScalarGridSpec(
            num_scalar_prefetch=0,
            grid=(n // tm,),
            in_specs=[pl.BlockSpec((tm, fin), lambda i: (i, 0)),
                      pl.BlockSpec((fin, fout), lambda i: (0, 0))],
            out_specs=pl.BlockSpec((tm, fout), lambda i: (i, 0)),
        ),
        compiler_params=pltpu.CompilerParams(
            dimension_semantics=("parallel",)),
    )(x, w)


def _aggregate_kernel(a_ref, xw_ref, b_ref, o_ref, acc_ref, *,
                      tk, resident, apply_relu):
    """out[i] = act(sum_k A[i,k] @ XW[k] + b); reduction axis (k) is last."""
    k = pl.program_id(1)

    @pl.when(k == 0)
    def _():
        acc_ref[...] = jnp.zeros_like(acc_ref)

    if resident:
        start = pl.multiple_of(k * tk, tk)
        xw_tile = xw_ref[pl.ds(start, tk), :]
    else:
        xw_tile = xw_ref[...]
    acc_ref[...] += jnp.dot(a_ref[...], xw_tile,
                            preferred_element_type=jnp.float32)

    @pl.when(k == pl.num_programs(1) - 1)
    def _():
        out = acc_ref[...] + b_ref[...]
        if apply_relu:
            out = jnp.maximum(out, 0.0)
        o_ref[...] = out.astype(o_ref.dtype)


def _aggregate(a, xw, b, *, apply_relu, out_dtype):
    n = a.shape[0]
    fout = xw.shape[1]
    tile = 512 if (n % 512 == 0 and n >= 1024) else 256   # never fall back to 128
    tm = tk = tile
    grid = (n // tm, n // tk)

    # Keep XW resident in VMEM when it fits (counting double buffering) so it
    # is DMA'd once instead of once per row tile.
    resident = 2 * xw.size * 2 <= 8 * _MIB
    if resident:
        xw_spec = pl.BlockSpec((n, fout), lambda i, k: (0, 0))
    else:
        xw_spec = pl.BlockSpec((tk, fout), lambda i, k: (k, 0))

    out_itemsize = jnp.dtype(out_dtype).itemsize
    xw_reads = 1 if resident else grid[0]      # real HBM traffic for XW
    flops = 2 * n * n * fout
    bytes_accessed = (a.size * 2 + xw.size * 2 * xw_reads + b.size * 4
                      + n * fout * out_itemsize)
    vmem_need = (3 * tm * tk * 2                                     # A (Buffered(3))
                 + (2 * xw.size * 2 if resident else 3 * tk * fout * 2)
                 + 2 * fout * 4                                      # bias
                 + 2 * tm * fout * out_itemsize                      # out tiles
                 + tm * fout * 4)                                    # f32 accumulator

    kernel = functools.partial(_aggregate_kernel, tk=tk, resident=resident,
                               apply_relu=apply_relu)
    return pl.pallas_call(
        kernel,
        out_shape=jax.ShapeDtypeStruct((n, fout), out_dtype),
        grid_spec=pltpu.PrefetchScalarGridSpec(
            num_scalar_prefetch=0,
            grid=grid,
            in_specs=[
                # A_hat tile: triple-buffered to hide DMA latency (v5e).
                pl.BlockSpec((tm, tk), lambda i, k: (i, k),
                             pipeline_mode=pl.Buffered(3)),
                xw_spec,
                pl.BlockSpec((1, fout), lambda i, k: (0, 0)),
            ],
            out_specs=pl.BlockSpec((tm, fout), lambda i, k: (i, 0)),
            scratch_shapes=[pltpu.VMEM((tm, fout), jnp.float32)],
        ),
        compiler_params=pltpu.CompilerParams(
            dimension_semantics=("parallel", "arbitrary"),
            vmem_limit_bytes=int(min(vmem_need + 8 * _MIB, 32 * _MIB))),
        cost_estimate=pl.CostEstimate(flops=flops, transcendentals=0,
                                      bytes_accessed=bytes_accessed),
    )(a, xw, b)


def _gcn_layer(a, x, w, b, *, apply_relu, out_dtype):
    n = a.shape[0]
    tile = 512 if (n % 512 == 0 and n >= 1024) else 256
    xw = _transform(x, w, tile)
    return _aggregate(a, xw, b, apply_relu=apply_relu, out_dtype=out_dtype)


# ----------------------------------------------------------------------------
# Forward pass
# ----------------------------------------------------------------------------
def gnn_forward(a_hat, x, w1, b1, w2, b2):
    """a_hat: (N,N) normalized adjacency; x: (N,Fin); w1: (Fin,H); b1: (1,H);
    w2: (H,Fout); b2: (1,Fout). Returns (N,Fout) float32."""
    n, fin = x.shape
    hid = w1.shape[1]
    fout = w2.shape[1]

    fin_p = _round_up(fin, _LANE)
    hid_p = _round_up(hid, _LANE)
    fout_p = _round_up(fout, _LANE)
    # Node axis: at least 256-granular; 512-granular for large graphs so the
    # tiled path always gets full 512 (or 256) tiles, never 128.
    n_p = _round_up(n, 256)
    if n_p > 2048:
        n_p = _round_up(n, 512)

    # Pad to MXU-friendly shapes; MXU operands in bf16 (f32 accumulation inside
    # the kernels). Zero padding is exact: padded A_hat rows/cols are zero, so
    # padded nodes/features never contaminate real outputs.
    a_p = _pad2(a_hat, (n_p, n_p)).astype(jnp.bfloat16)
    x_p = _pad2(x, (n_p, fin_p)).astype(jnp.bfloat16)
    w1_p = _pad2(w1, (fin_p, hid_p)).astype(jnp.bfloat16)
    b1_p = _pad2(b1, (1, hid_p)).astype(jnp.float32)
    w2_p = _pad2(w2, (hid_p, fout_p)).astype(jnp.bfloat16)
    b2_p = _pad2(b2, (1, fout_p)).astype(jnp.float32)

    if _fused_vmem_bytes(n_p, fin_p, hid_p, fout_p) <= _FUSED_VMEM_BUDGET:
        out = _fused_gnn(a_p, x_p, w1_p, b1_p, w2_p, b2_p)
    else:
        h = _gcn_layer(a_p, x_p, w1_p, b1_p, apply_relu=True,
                       out_dtype=jnp.bfloat16)
        out = _gcn_layer(a_p, h, w2_p, b2_p, apply_relu=False,
                         out_dtype=jnp.float32)
    return out[:n, :fout]


def build_normalized_adjacency(edge_index, num_nodes):
    """Dense GCN-normalized adjacency from a (2, E) edge_index (host-side glue).

    Matches torch_geometric gcn_norm defaults (add_remaining_self_loops, unit
    weights): all edges kept (duplicates and explicit self-loops summed), a
    unit self-loop added only for nodes without one, then D^-1/2 A D^-1/2.
    """
    src, dst = edge_index[0], edge_index[1]
    # message flows src -> dst (aggregated at dst): A[dst, src] += 1
    a = jnp.zeros((num_nodes, num_nodes), jnp.float32).at[dst, src].add(1.0)
    diag = jnp.diagonal(a)
    a = a + jnp.diag(jnp.where(diag == 0, 1.0, 0.0))  # remaining self-loops only
    deg = a.sum(axis=1)
    dinv = jnp.where(deg > 0, 1.0 / jnp.sqrt(deg), 0.0)
    return dinv[:, None] * a * dinv[None, :]


def init_params(key, input_dim, hidden_dim, output_dim):
    k1, k2 = jax.random.split(key)

    # glorot-uniform weights stored already transposed: (in, out); zero bias.
    def glorot(k, fan_in, fan_out):
        lim = jnp.sqrt(6.0 / (fan_in + fan_out))
        return jax.random.uniform(k, (fan_in, fan_out), jnp.float32, -lim, lim)

    w1 = glorot(k1, input_dim, hidden_dim)
    b1 = jnp.zeros((1, hidden_dim), jnp.float32)
    w2 = glorot(k2, hidden_dim, output_dim)
    b2 = jnp.zeros((1, output_dim), jnp.float32)
    return w1, b1, w2, b2


if __name__ == "__main__":
    key = jax.random.PRNGKey(0)
    k_x, k_e, k_p = jax.random.split(key, 3)

    num_nodes = 16
    input_dim, hidden_dim, output_dim = 8, 32, 16
    num_edges = 40

    x = jax.random.normal(k_x, (num_nodes, input_dim), jnp.float32)
    edge_index = jax.random.randint(k_e, (2, num_edges), 0, num_nodes,
                                    dtype=jnp.int32)

    a_hat = build_normalized_adjacency(edge_index, num_nodes)
    w1, b1, w2, b2 = init_params(k_p, input_dim, hidden_dim, output_dim)

    out = jax.jit(gnn_forward)(a_hat, x, w1, b1, w2, b2)
    out = jax.block_until_ready(out)

    # sanity check against pure-JAX f32 reference (kernel uses bf16 MXU inputs,
    # f32 accumulation, so tolerance is loosened accordingly).
    ref_h = jnp.maximum(a_hat @ (x @ w1) + b1, 0.0)
    ref = a_hat @ (ref_h @ w2) + b2
    assert out.shape == (num_nodes, output_dim)
    max_err = float(jnp.max(jnp.abs(out - ref)))
    assert jnp.allclose(out, ref, atol=5e-2, rtol=5e-2), max_err

    print("KERNEL_OK")
</pallas_src>

<mosaic_0001>
module attributes {stable_mosaic.version = 11 : i64} {
  func.func @_fused_gnn_kernel(%arg0: memref<256x256xbf16, #tpu.memory_space<vmem>>, %arg1: memref<256x128xbf16, #tpu.memory_space<vmem>>, %arg2: memref<128x128xbf16, #tpu.memory_space<vmem>>, %arg3: memref<1x128xf32, #tpu.memory_space<vmem>>, %arg4: memref<128x128xbf16, #tpu.memory_space<vmem>>, %arg5: memref<1x128xf32, #tpu.memory_space<vmem>>, %arg6: memref<256x128xf32, #tpu.memory_space<vmem>>) attributes {dimension_semantics = [], scalar_prefetch = 0 : i64, scratch_operands = 0 : i64, tpu.core_type = #tpu.core_type<tc>} {
    %c0 = arith.constant 0 : index
    %c0_0 = arith.constant 0 : index
    %0 = vector.load %arg1[%c0, %c0_0] : memref<256x128xbf16, #tpu.memory_space<vmem>>, vector<256x128xbf16>
    %c0_1 = arith.constant 0 : index
    %c0_2 = arith.constant 0 : index
    %1 = vector.load %arg2[%c0_1, %c0_2] : memref<128x128xbf16, #tpu.memory_space<vmem>>, vector<128x128xbf16>
    %cst = arith.constant dense<0.000000e+00> : vector<256x128xf32>
    %2 = tpu.matmul %0, %1, %cst {dimension_numbers = #tpu.dot_dimension_numbers<[1], [0], [0], [1], [0, 0, 1, 1], [], []>} : vector<256x128xbf16>, vector<128x128xbf16>, vector<256x128xf32> -> vector<256x128xf32>
    %c0_3 = arith.constant 0 : index
    %c0_4 = arith.constant 0 : index
    %3 = vector.load %arg0[%c0_3, %c0_4] : memref<256x256xbf16, #tpu.memory_space<vmem>>, vector<256x256xbf16>
    %4 = arith.truncf %2 : vector<256x128xf32> to vector<256x128xbf16>
    %cst_5 = arith.constant dense<0.000000e+00> : vector<256x128xf32>
    %5 = tpu.matmul %3, %4, %cst_5 {dimension_numbers = #tpu.dot_dimension_numbers<[1], [0], [0], [1], [0, 0, 1, 1], [], []>} : vector<256x256xbf16>, vector<256x128xbf16>, vector<256x128xf32> -> vector<256x128xf32>
    %c0_6 = arith.constant 0 : index
    %c0_7 = arith.constant 0 : index
    %6 = vector.load %arg3[%c0_6, %c0_7] : memref<1x128xf32, #tpu.memory_space<vmem>>, vector<1x128xf32>
    %7 = vector.broadcast %6 : vector<1x128xf32> to vector<256x128xf32>
    %8 = arith.addf %5, %7 : vector<256x128xf32>
    %cst_8 = arith.constant 0.000000e+00 : f32
    %9 = vector.broadcast %cst_8 : f32 to vector<256x128xf32>
    %10 = arith.maximumf %8, %9 : vector<256x128xf32>
    %11 = arith.truncf %10 : vector<256x128xf32> to vector<256x128xbf16>
    %c0_9 = arith.constant 0 : index
    %c0_10 = arith.constant 0 : index
    %12 = vector.load %arg4[%c0_9, %c0_10] : memref<128x128xbf16, #tpu.memory_space<vmem>>, vector<128x128xbf16>
    %cst_11 = arith.constant dense<0.000000e+00> : vector<256x128xf32>
    %13 = tpu.matmul %11, %12, %cst_11 {dimension_numbers = #tpu.dot_dimension_numbers<[1], [0], [0], [1], [0, 0, 1, 1], [], []>} : vector<256x128xbf16>, vector<128x128xbf16>, vector<256x128xf32> -> vector<256x128xf32>
    %c0_12 = arith.constant 0 : index
    %c0_13 = arith.constant 0 : index
    %14 = vector.load %arg0[%c0_12, %c0_13] : memref<256x256xbf16, #tpu.memory_space<vmem>>, vector<256x256xbf16>
    %15 = arith.truncf %13 : vector<256x128xf32> to vector<256x128xbf16>
    %cst_14 = arith.constant dense<0.000000e+00> : vector<256x128xf32>
    %16 = tpu.matmul %14, %15, %cst_14 {dimension_numbers = #tpu.dot_dimension_numbers<[1], [0], [0], [1], [0, 0, 1, 1], [], []>} : vector<256x256xbf16>, vector<256x128xbf16>, vector<256x128xf32> -> vector<256x128xf32>
    %c0_15 = arith.constant 0 : index
    %c0_16 = arith.constant 0 : index
    %17 = vector.load %arg5[%c0_15, %c0_16] : memref<1x128xf32, #tpu.memory_space<vmem>>, vector<1x128xf32>
    %18 = vector.broadcast %17 : vector<1x128xf32> to vector<256x128xf32>
    %19 = arith.addf %16, %18 : vector<256x128xf32>
    %c0_17 = arith.constant 0 : index
    %c0_18 = arith.constant 0 : index
    %20 = vector.load %arg6[%c0_17, %c0_18] : memref<256x128xf32, #tpu.memory_space<vmem>>, vector<256x128xf32>
    tpu.vector_store %arg6[%c0_17, %c0_18], %19 {strides = array<i32>} : memref<256x128xf32, #tpu.memory_space<vmem>>, vector<256x128xf32>,
    return
  }
}

</mosaic_0001>

<bundles_post_ra>
// kernel: gnn_forward.1
= control target key start
LH: loop header
LB: loop body
LE: loop exit
PB: predicated region body
PF: predicated region fallthrough
CT: control target
= control target key end

     0   :  { %s2181_s2 = inlined_call_operand.vmem [shape: bf16[128,128], index: 2, kind: input, shape index: {}]   ;;  %s2182_s1 = inlined_call_operand.vmem [shape: bf16[256,128], index: 1, kind: input, shape index: {}]   ;;  %s2183_s0 = inlined_call_operand.vmem [shape: bf16[256,256], index: 0, kind: input, shape index: {}]   ;;  %s2184_s3 = inlined_call_operand.vmem [shape: f32[1,128], index: 3, kind: input, shape index: {}]   ;;  %s2185_s4 = inlined_call_operand.vmem [shape: bf16[128,128], index: 4, kind: input, shape index: {}]   ;;  %s2186_s5 = inlined_call_operand.vmem [shape: f32[1,128], index: 5, kind: input, shape index: {}]   ;;  %s2187_s6 = inlined_call_operand.vmem [shape: f32[256,128], index: 6, kind: output, shape index: {}]  }
   0x1   :  { %v1408_v0 = vld [vmem:[%s2181_s2 + $0x38] sm:$0xff]  ;;  %v1407_v1 = vld [vmem:[%s2181_s2 + $0x30] sm:$0xff]  ;;  %v1406_v2 = vld [vmem:[%s2181_s2 + $0x28] sm:$0xff] }
   0x2   :  { %215 = vmatpush.bf16.msra.mxu0 %v1408_v0  ;;  %1449 = vmatpush.bf16.msra.mxu2 %v1408_v0  ;;  %v1405_v3 = vld [vmem:[%s2181_s2 + $0x20] sm:$0xff]  ;;  %v1404_v4 = vld [vmem:[%s2181_s2 + $0x18] sm:$0xff]  ;;  %v1403_v5 = vld [vmem:[%s2181_s2 + $0x10] sm:$0xff] }
   0x3   :  { %v1402_v6 = vld [vmem:[%s2181_s2 + $0x8] sm:$0xff]  ;;  %v1401_v7 = vld [vmem:[%s2181_s2] sm:$0xff]  ;;  %v1387_v12 = vld [vmem:[%s2182_s1 + $0x10] sm:$0xff] }
   0x4   :  { %v1385_v8 = vld [vmem:[%s2182_s1] sm:$0xff]  ;;  %v1386_v10 = vld [vmem:[%s2182_s1 + $0x8] sm:$0xff]  ;;  %v1395_v13 = vld [vmem:[%s2182_s1 + $0x50] sm:$0xff] }
   0x5   :  { %v1393_v9 = vld [vmem:[%s2182_s1 + $0x40] sm:$0xff]  ;;  %v1394_v11 = vld [vmem:[%s2182_s1 + $0x48] sm:$0xff]  ;;  %v1388_v14 = vld [vmem:[%s2182_s1 + $0x18] sm:$0xff] }
   0x6   :  { %216 = vmatpush.bf16.msra.mxu0 %v1407_v1  ;;  %1450 = vmatpush.bf16.msra.mxu2 %v1407_v1  ;;  %v1396_v15 = vld [vmem:[%s2182_s1 + $0x58] sm:$0xff]  ;;  %v1389_v16 = vld [vmem:[%s2182_s1 + $0x20] sm:$0xff]  ;;  %v1390_v18 = vld [vmem:[%s2182_s1 + $0x28] sm:$0xff] }
   0x7   :  { %v1397_v17 = vld [vmem:[%s2182_s1 + $0x60] sm:$0xff]  ;;  %v1398_v19 = vld [vmem:[%s2182_s1 + $0x68] sm:$0xff]  ;;  %v1391_v20 = vld [vmem:[%s2182_s1 + $0x30] sm:$0xff] }
   0x8   :  { %v1399_v21 = vld [vmem:[%s2182_s1 + $0x70] sm:$0xff]  ;;  %v1392_v22 = vld [vmem:[%s2182_s1 + $0x38] sm:$0xff] }
   0x9   :  { %v1400_v23 = vld [vmem:[%s2182_s1 + $0x78] sm:$0xff] }
   0xa   :  { %217 = vmatpush.bf16.msra.mxu0 %v1406_v2  ;;  %1451 = vmatpush.bf16.msra.mxu2 %v1406_v2 }
   0xe   :  { %218 = vmatpush.bf16.msra.mxu0 %v1405_v3  ;;  %1452 = vmatpush.bf16.msra.mxu2 %v1405_v3 }
  0x12   :  { %219 = vmatpush.bf16.msra.mxu0 %v1404_v4  ;;  %1453 = vmatpush.bf16.msra.mxu2 %v1404_v4  ;;  %v1227_v4 = vld [vmem:[%s2183_s0] sm:$0xf] }
  0x16   :  { %220 = vmatpush.bf16.msra.mxu0 %v1403_v5  ;;  %1454 = vmatpush.bf16.msra.mxu2 %v1403_v5 }
  0x1a   :  { %221 = vmatpush.bf16.msra.mxu0 %v1402_v6  ;;  %1455 = vmatpush.bf16.msra.mxu2 %v1402_v6  ;;  %v1410_v6 = vld [vmem:[%s2183_s0 + $0x4] sm:$0xf0] }
  0x1e   :  { %222 = vmatpush.bf16.msra.mxu0 %v1401_v7  ;;  %1456 = vmatpush.bf16.msra.mxu2 %v1401_v7  ;;  %v1291_v7 = vld [vmem:[%s2183_s0 + $0x80] sm:$0xf] }
  0x21   :  { %223 = vmatmul.bf16.vlgmr.msra.gmra.mxu0 %v1385_v8  ;;  %263 = vmatmul.bf16.vlgmr.msra.gmra.mxu2 %v1393_v9  ;;  %v1426_v8 = vld [vmem:[%s2183_s0 + $0x84] sm:$0xf0] }
  0x31   :  { %228 = vmatmul.bf16.gmra.mxu0 %v1386_v10  ;;  %268 = vmatmul.bf16.gmra.mxu2 %v1394_v11  ;;  %v1600_v10 = vor.u32 %v1410_v6, %v1227_v4  ;;  %v1602_v11 = vor.u32 %v1426_v8, %v1291_v7  ;;  %v1446_v6 = vld [vmem:[%s2185_s4 + $0x28] sm:$0xff]  ;;  %v1421_v7 = vld [vmem:[%s2183_s0 + $0x64] sm:$0xf] }
  0x32   :  { %v1277_v8 = vld [vmem:[%s2183_s0 + $0x68] sm:$0xf0] }
  0x41   :  { %233 = vmatmul.bf16.gmra.mxu0 %v1387_v12  ;;  %273 = vmatmul.bf16.gmra.mxu2 %v1395_v13  ;;  %v1409_v13 = vld [vmem:[%s2183_s0 + $0x4] sm:$0xf] }
  0x51   :  { %238 = vmatmul.bf16.gmra.mxu0 %v1388_v14  ;;  %278 = vmatmul.bf16.gmra.mxu2 %v1396_v15  ;;  %v1229_v14 = vld [vmem:[%s2183_s0 + $0x8] sm:$0xf0] }
  0x61   :  { %243 = vmatmul.bf16.gmra.mxu0 %v1389_v16  ;;  %283 = vmatmul.bf16.gmra.mxu2 %v1397_v17  ;;  %v1616_v16 = vor.u32 %v1409_v13, %v1229_v14  ;;  %v1235_v17 = vld [vmem:[%s2183_s0 + $0x10] sm:$0xf]  ;;  %v1444_v13 = vld [vmem:[%s2185_s4 + $0x18] sm:$0xff] }
  0x62   :  { %v1283_v14 = vld [vmem:[%s2183_s0 + $0x70] sm:$0xf] }
  0x71   :  { %248 = vmatmul.bf16.gmra.mxu0 %v1390_v18  ;;  %288 = vmatmul.bf16.gmra.mxu2 %v1398_v19  ;;  %v1412_v18 = vld [vmem:[%s2183_s0 + $0x14] sm:$0xf0]  ;;  %v1299_v19 = vld [vmem:[%s2183_s0 + $0x90] sm:$0xf] }
  0x81   :  { %253 = vmatmul.bf16.gmra.mxu0 %v1391_v20  ;;  %293 = vmatmul.bf16.gmra.mxu2 %v1399_v21  ;;  %v1428_v20 = vld [vmem:[%s2183_s0 + $0x94] sm:$0xf0]  ;;  %v1631_v21 = vor.u32 %v1412_v18, %v1235_v17  ;;  %v1347_v17 = vld [vmem:[%s2183_s0 + $0xf0] sm:$0xf] }
  0x82   :  { %v1440_v18 = vld [vmem:[%s2183_s0 + $0xf4] sm:$0xf0] }
  0x91   :  { %258 = vmatmul.bf16.gmra.mxu0 %v1392_v22  ;;  %298 = vmatmul.bf16.gmra.mxu2 %v1400_v23  ;;  %v1633_v22 = vor.u32 %v1428_v20, %v1299_v19  ;;  %v1411_v23 = vld [vmem:[%s2183_s0 + $0x14] sm:$0xf] }
  0x92   :  { %v1443_v19 = vld [vmem:[%s2185_s4 + $0x10] sm:$0xff] }
  0x9e   :  { %v1574_v24 = vpop.f32.mrf.mxu0 }
  0xa4   :  { %v1576_v25 = vpop.f32.mrf.mxu2 }
  0xa6   :  { %v1578_v26 = vpop.f32.mrf.mxu0 }
  0xa7   :  { %v336_v9 = vpack.c.bf16 %v1578_v26, %v1574_v24  ;;  %v1237_v24 = vld [vmem:[%s2183_s0 + $0x18] sm:$0xf0]  ;;  %v1243_v26 = vld [vmem:[%s2183_s0 + $0x20] sm:$0xf] }
  0xac   :  { %v1580_v27 = vpop.f32.mrf.mxu2 }
  0xad   :  { %v344_v15 = vpack.c.bf16 %v1580_v27, %v1576_v25  ;;  %v1643_v25 = vor.u32 %v1411_v23, %v1237_v24  ;;  %v1414_v27 = vld [vmem:[%s2183_s0 + $0x24] sm:$0xf0]  ;;  %v1813_v23 = vor.u32 %v1440_v18, %v1347_v17  ;;  %v1423_v24 = vld [vmem:[%s2183_s0 + $0x74] sm:$0xf] }
  0xae   :  { %v229_v28 = vpop.f32.mrf.mxu0 }
  0xb4   :  { %v1582_v29 = vpop.f32.mrf.mxu2 }
  0xb6   :  { %v231_v30 = vpop.f32.mrf.mxu0 }
  0xb7   :  { %v337_v3 = vpack.c.bf16 %v231_v30, %v229_v28  ;;  %v1307_v28 = vld [vmem:[%s2183_s0 + $0xa0] sm:$0xf]  ;;  %v1658_v30 = vor.u32 %v1414_v27, %v1243_v26  ;;  %v1285_v26 = vld [vmem:[%s2183_s0 + $0x78] sm:$0xf0]  ;;  %v1442_v27 = vld [vmem:[%s2185_s4 + $0x8] sm:$0xff] }
  0xbc   :  { %v1584_v31 = vpop.f32.mrf.mxu2 }
  0xbd   :  { %v345_v12 = vpack.c.bf16 %v1584_v31, %v1582_v29  ;;  %v1430_v29 = vld [vmem:[%s2183_s0 + $0xa4] sm:$0xf0] }
  0xbe   :  { %v234_v32 = vpop.f32.mrf.mxu0  ;;  %v1660_v31 = vor.u32 %v1430_v29, %v1307_v28  ;;  %v1826_v28 = vor.u32 %v1423_v24, %v1285_v26  ;;  %v1441_v29 = vld [vmem:[%s2185_s4] sm:$0xff] }
  0xc4   :  { %v274_v33 = vpop.f32.mrf.mxu2 }
  0xc6   :  { %v236_v34 = vpop.f32.mrf.mxu0 }
  0xc7   :  { %v338_v1 = vpack.c.bf16 %v236_v34, %v234_v32  ;;  %v1413_v32 = vld [vmem:[%s2183_s0 + $0x24] sm:$0xf] }
  0xcc   :  { %v276_v35 = vpop.f32.mrf.mxu2 }
  0xcd   :  { %v346_v5 = vpack.c.bf16 %v276_v35, %v274_v33  ;;  %v1245_v33 = vld [vmem:[%s2183_s0 + $0x28] sm:$0xf0]  ;;  %v1251_v35 = vld [vmem:[%s2183_s0 + $0x30] sm:$0xf] }
  0xce   :  { %v239_v36 = vpop.f32.mrf.mxu0  ;;  %v1670_v34 = vor.u32 %v1413_v32, %v1245_v33  ;;  %v1425_v33 = vld [vmem:[%s2183_s0 + $0x84] sm:$0xf] }
  0xd4   :  { %v279_v37 = vpop.f32.mrf.mxu2 }
  0xd6   :  { %v241_v38 = vpop.f32.mrf.mxu0 }
  0xd7   :  { %v339_v63 = vpack.c.bf16 %v241_v38, %v239_v36  ;;  %v1416_v36 = vld [vmem:[%s2183_s0 + $0x34] sm:$0xf0] }
  0xd8   :  { %v1432_v38 = vld [vmem:[%s2183_s0 + $0xb4] sm:$0xf0] }
  0xdc   :  { %v281_v39 = vpop.f32.mrf.mxu2 }
  0xdd   :  { %v347_v2 = vpack.c.bf16 %v281_v39, %v279_v37  ;;  %v1315_v37 = vld [vmem:[%s2183_s0 + $0xb0] sm:$0xf]  ;;  %v1685_v39 = vor.u32 %v1416_v36, %v1251_v35  ;;  %v1293_v35 = vld [vmem:[%s2183_s0 + $0x88] sm:$0xf0] }
  0xde   :  { %v244_v40 = vpop.f32.mrf.mxu0  ;;  %v1838_v36 = vor.u32 %v1425_v33, %v1293_v35  ;;  %v1431_v35 = vld [vmem:[%s2183_s0 + $0xb4] sm:$0xf] }
  0xe4   :  { %v284_v41 = vpop.f32.mrf.mxu2 }
  0xe6   :  { %v246_v42 = vpop.f32.mrf.mxu0 }
  0xe7   :  { %v340_v61 = vpack.c.bf16 %v246_v42, %v244_v40  ;;  %v1687_v40 = vor.u32 %v1432_v38, %v1315_v37  ;;  %v1253_v42 = vld [vmem:[%s2183_s0 + $0x38] sm:$0xf0] }
  0xec   :  { %v286_v43 = vpop.f32.mrf.mxu2 }
  0xed   :  { %v348_v0 = vpack.c.bf16 %v286_v43, %v284_v41  ;;  %v1415_v41 = vld [vmem:[%s2183_s0 + $0x34] sm:$0xf] }
  0xee   :  { %v249_v44 = vpop.f32.mrf.mxu0  ;;  %v1697_v43 = vor.u32 %v1415_v41, %v1253_v42  ;;  %v1846_v41 = vld [vmem:[%s2184_s3] ss:$0 sm:$0xff] }
  0xf4   :  { %v289_v45 = vpop.f32.mrf.mxu2 }
  0xf6   :  { %v251_v46 = vpop.f32.mrf.mxu0 }
  0xf7   :  { %v341_v59 = vpack.c.bf16 %v251_v46, %v249_v44  ;;  %v1259_v44 = vld [vmem:[%s2183_s0 + $0x40] sm:$0xf] }
  0xf8   :  { %v1323_v46 = vld [vmem:[%s2183_s0 + $0xc0] sm:$0xf] }
  0xfc   :  { %v291_v47 = vpop.f32.mrf.mxu2 }
  0xfd   :  { %v349_v62 = vpack.c.bf16 %v291_v47, %v289_v45  ;;  %v1418_v45 = vld [vmem:[%s2183_s0 + $0x44] sm:$0xf0] }
  0xfe   :  { %v254_v48 = vpop.f32.mrf.mxu0  ;;  %v1434_v47 = vld [vmem:[%s2183_s0 + $0xc4] sm:$0xf0] }
 0x104   :  { %v294_v49 = vpop.f32.mrf.mxu2 }
 0x106   :  { %v256_v50 = vpop.f32.mrf.mxu0 }
 0x107   :  { %v342_v56 = vpack.c.bf16 %v256_v50, %v254_v48  ;;  %v1712_v48 = vor.u32 %v1418_v45, %v1259_v44  ;;  %v1417_v50 = vld [vmem:[%s2183_s0 + $0x44] sm:$0xf] }
 0x10c   :  { %v296_v51 = vpop.f32.mrf.mxu2 }
 0x10d   :  { %v350_v60 = vpack.c.bf16 %v296_v51, %v294_v49  ;;  %v1714_v49 = vor.u32 %v1434_v47, %v1323_v46  ;;  %v1261_v51 = vld [vmem:[%s2183_s0 + $0x48] sm:$0xf0]  ;;  %v1427_v47 = vld [vmem:[%s2183_s0 + $0x94] sm:$0xf] }
 0x10e   :  { %v259_v52 = vpop.f32.mrf.mxu0 }
 0x114   :  { %v299_v53 = vpop.f32.mrf.mxu2 }
 0x116   :  { %v261_v54 = vpop.f32.mrf.mxu0 }
 0x117   :  { %v343_v55 = vpack.c.bf16 %v261_v54, %v259_v52  ;;  %v1724_v52 = vor.u32 %v1417_v50, %v1261_v51  ;;  %v1420_v54 = vld [vmem:[%s2183_s0 + $0x54] sm:$0xf0]  ;;  %v1301_v50 = vld [vmem:[%s2183_s0 + $0x98] sm:$0xf0] }
 0x119   :  { %516 = vmatpush.bf16.msra.mxu1 %v343_v55  ;;  %1457 = vmatpush.bf16.msra.mxu3 %v343_v55  ;;  %v1331_v55 = vld [vmem:[%s2183_s0 + $0xd0] sm:$0xf] }
 0x11c   :  { %v301_v57 = vpop.f32.mrf.mxu2 }
 0x11d   :  { %517 = vmatpush.bf16.msra.mxu1 %v342_v56  ;;  %1458 = vmatpush.bf16.msra.mxu3 %v342_v56  ;;  %v351_v58 = vpack.c.bf16 %v301_v57, %v299_v53  ;;  %v1267_v53 = vld [vmem:[%s2183_s0 + $0x50] sm:$0xf]  ;;  %v1436_v56 = vld [vmem:[%s2183_s0 + $0xd4] sm:$0xf0] }
 0x11e   :  { %v1739_v57 = vor.u32 %v1420_v54, %v1267_v53 }
 0x11f   :  { %605 = vmatpush.bf16.msrb.mxu2 %v351_v58  ;;  %v1741_v58 = vor.u32 %v1436_v56, %v1331_v55  ;;  %v1858_v56 = vor.u32 %v1427_v47, %v1301_v50 }
 0x121   :  { %518 = vmatpush.bf16.msra.mxu1 %v341_v59  ;;  %1459 = vmatpush.bf16.msra.mxu3 %v341_v59  ;;  %v1419_v59 = vld [vmem:[%s2183_s0 + $0x54] sm:$0xf] }
 0x123   :  { %606 = vmatpush.bf16.msrb.mxu2 %v350_v60  ;;  %v1269_v60 = vld [vmem:[%s2183_s0 + $0x58] sm:$0xf0] }
 0x125   :  { %519 = vmatpush.bf16.msra.mxu1 %v340_v61  ;;  %1460 = vmatpush.bf16.msra.mxu3 %v340_v61  ;;  %v1751_v61 = vor.u32 %v1419_v59, %v1269_v60 }
 0x127   :  { %607 = vmatpush.bf16.msrb.mxu2 %v349_v62  ;;  %v1448_v62 = vld [vmem:[%s2185_s4 + $0x38] sm:$0xff] }
 0x129   :  { %520 = vmatpush.bf16.msra.mxu1 %v339_v63  ;;  %1461 = vmatpush.bf16.msra.mxu3 %v339_v63  ;;  %v1275_v63 = vld [vmem:[%s2183_s0 + $0x60] sm:$0xf] }
 0x12b   :  { %608 = vmatpush.bf16.msrb.mxu2 %v348_v0  ;;  %v1447_v0 = vld [vmem:[%s2185_s4 + $0x30] sm:$0xff] }
 0x12d   :  { %521 = vmatpush.bf16.msra.mxu1 %v338_v1  ;;  %1462 = vmatpush.bf16.msra.mxu3 %v338_v1  ;;  %v1422_v1 = vld [vmem:[%s2183_s0 + $0x64] sm:$0xf0] }
 0x12e   :  { %v1772_v4 = vor.u32 %v1422_v1, %v1275_v63 }
 0x12f   :  { %609 = vmatpush.bf16.msrb.mxu2 %v347_v2  ;;  %v1339_v2 = vld [vmem:[%s2183_s0 + $0xe0] sm:$0xf] }
 0x131   :  { %522 = vmatpush.bf16.msra.mxu1 %v337_v3  ;;  %1463 = vmatpush.bf16.msra.mxu3 %v337_v3  ;;  %v1438_v3 = vld [vmem:[%s2183_s0 + $0xe4] sm:$0xf0] }
 0x133   :  { %610 = vmatpush.bf16.msrb.mxu2 %v346_v5  ;;  %v1774_v5 = vor.u32 %v1438_v3, %v1339_v2 }
 0x135   :  { %523 = vmatpush.bf16.msra.mxu1 %v336_v9  ;;  %1464 = vmatpush.bf16.msra.mxu3 %v336_v9  ;;  %v1445_v9 = vld [vmem:[%s2185_s4 + $0x20] sm:$0xff] }
 0x137   :  { %611 = vmatpush.bf16.msrb.mxu2 %v345_v12  ;;  %v1790_v12 = vor.u32 %v1421_v7, %v1277_v8  ;;  %v1429_v7 = vld [vmem:[%s2183_s0 + $0xa4] sm:$0xf]  ;;  %v1309_v8 = vld [vmem:[%s2183_s0 + $0xa8] sm:$0xf0] }
 0x138   :  { %524 = vmatmul.bf16.vlgmr.msra.gmra.mxu1 %v1600_v10  ;;  %564 = vmatmul.bf16.vlgmr.msra.gmra.mxu3 %v1602_v11  ;;  %v1873_v17 = vor.u32 %v1429_v7, %v1309_v8 }
 0x139   :  { %806 = vmatpush.bf16.msrb.mxu3 %v1448_v62 }
 0x13b   :  { %612 = vmatpush.bf16.msrb.mxu2 %v344_v15  ;;  %v1424_v15 = vld [vmem:[%s2183_s0 + $0x74] sm:$0xf0] }
 0x13c   :  { %v1811_v20 = vor.u32 %v1424_v15, %v1283_v14 }
 0x13d   :  { %807 = vmatpush.bf16.msrb.mxu3 %v1447_v0 }
 0x13e   :  { %613 = vmatmul.bf16.vlgmr.msrb.gmra.mxu2 %v1616_v16 }
 0x141   :  { %808 = vmatpush.bf16.msrb.mxu3 %v1446_v6 }
 0x145   :  { %809 = vmatpush.bf16.msrb.mxu3 %v1445_v9 }
 0x148   :  { %529 = vmatmul.bf16.gmra.mxu1 %v1631_v21  ;;  %569 = vmatmul.bf16.gmra.mxu3 %v1633_v22 }
 0x149   :  { %810 = vmatpush.bf16.msrb.mxu3 %v1444_v13 }
 0x14d   :  { %811 = vmatpush.bf16.msrb.mxu3 %v1443_v19 }
 0x14e   :  { %618 = vmatmul.bf16.gmra.mxu2 %v1643_v25 }
 0x151   :  { %812 = vmatpush.bf16.msrb.mxu3 %v1442_v27 }
 0x155   :  { %813 = vmatpush.bf16.msrb.mxu3 %v1441_v29 }
 0x158   :  { %534 = vmatmul.bf16.gmra.mxu1 %v1658_v30  ;;  %574 = vmatmul.bf16.gmra.mxu3 %v1660_v31 }
 0x15e   :  { %623 = vmatmul.bf16.gmra.mxu2 %v1670_v34 }
 0x168   :  { %539 = vmatmul.bf16.gmra.mxu1 %v1685_v39  ;;  %579 = vmatmul.bf16.gmra.mxu3 %v1687_v40 }
 0x16e   :  { %628 = vmatmul.bf16.gmra.mxu2 %v1697_v43 }
 0x178   :  { %544 = vmatmul.bf16.gmra.mxu1 %v1712_v48  ;;  %584 = vmatmul.bf16.gmra.mxu3 %v1714_v49 }
 0x17e   :  { %633 = vmatmul.bf16.gmra.mxu2 %v1724_v52 }
 0x188   :  { %549 = vmatmul.bf16.gmra.mxu1 %v1739_v57  ;;  %589 = vmatmul.bf16.gmra.mxu3 %v1741_v58 }
 0x18e   :  { %638 = vmatmul.bf16.gmra.mxu2 %v1751_v61 }
 0x198   :  { %554 = vmatmul.bf16.gmra.mxu1 %v1772_v4  ;;  %594 = vmatmul.bf16.gmra.mxu3 %v1774_v5 }
 0x19e   :  { %643 = vmatmul.bf16.gmra.mxu2 %v1790_v12 }
 0x1a8   :  { %559 = vmatmul.bf16.gmra.mxu1 %v1811_v20  ;;  %599 = vmatmul.bf16.gmra.mxu3 %v1813_v23 }
 0x1ae   :  { %648 = vmatmul.bf16.gmra.mxu2 %v1826_v28 }
 0x1b5   :  { %v525_v32 = vpop.f32.mrf.mxu1 }
 0x1b6   :  { %v526_v45 = vadd.f32 %v1846_v41, %v525_v32 }
 0x1bb   :  { %v1840_v37 = vpop.f32.mrf.mxu3 }
 0x1bd   :  { %v527_v38 = vpop.f32.mrf.mxu1 }
 0x1be   :  { %653 = vmatmul.bf16.gmra.mxu2 %v1838_v36  ;;  %v528_v51 = vadd.f32 %v1846_v41, %v527_v38  ;;  %v1317_v38 = vld [vmem:[%s2183_s0 + $0xb8] sm:$0xf0] }
 0x1c1   :  { %v614_v42 = vpop.f32.mrf.mxu2 }
 0x1c2   :  { %v615_v53 = vadd.f32 %v614_v42, %v526_v45 }
 0x1c3   :  { %v1848_v44 = vpop.f32.mrf.mxu3 }
 0x1c4   :  { %v694_v60 = vmax.f32 %v615_v53, 0.0 }
 0x1c5   :  { %v530_v46 = vpop.f32.mrf.mxu1 }
 0x1c6   :  { %v531_v3 = vadd.f32 %v1846_v41, %v530_v46 }
 0x1c9   :  { %v616_v54 = vpop.f32.mrf.mxu2 }
 0x1ca   :  { %v617_v55 = vadd.f32 %v616_v54, %v528_v51  ;;  %v1888_v51 = vor.u32 %v1431_v35, %v1317_v38  ;;  %v1435_v38 = vld [vmem:[%s2183_s0 + $0xd4] sm:$0xf] }
 0x1cb   :  { %v1860_v59 = vpop.f32.mrf.mxu3 }
 0x1cc   :  { %v695_v62 = vmax.f32 %v617_v55, 0.0 }
 0x1cd   :  { %v532_v63 = vpop.f32.mrf.mxu1 }
 0x1ce   :  { %658 = vmatmul.bf16.gmra.mxu2 %v1858_v56  ;;  %v726_v0 = vpack.c.bf16 %v695_v62, %v694_v60  ;;  %v533_v9 = vadd.f32 %v1846_v41, %v532_v63 }
 0x1d0   :  { %814 = vmatmul.bf16.vlgmr.msrb.gmra.mxu3 %v726_v0 }
 0x1d1   :  { %v619_v1 = vpop.f32.mrf.mxu2 }
 0x1d2   :  { %v620_v13 = vadd.f32 %v619_v1, %v531_v3  ;;  %v1433_v3 = vld [vmem:[%s2183_s0 + $0xc4] sm:$0xf] }
 0x1d3   :  { %v1863_v2 = vpop.f32.mrf.mxu3 }
 0x1d4   :  { %v696_v18 = vmax.f32 %v620_v13, 0.0 }
 0x1d5   :  { %v535_v6 = vpop.f32.mrf.mxu1 }
 0x1d6   :  { %v536_v32 = vadd.f32 %v1846_v41, %v535_v6  ;;  %v1325_v6 = vld [vmem:[%s2183_s0 + $0xc8] sm:$0xf0] }
 0x1d9   :  { %v621_v14 = vpop.f32.mrf.mxu2 }
 0x1da   :  { %v622_v15 = vadd.f32 %v621_v14, %v533_v9  ;;  %v1901_v14 = vor.u32 %v1433_v3, %v1325_v6 }
 0x1db   :  { %v1875_v26 = vpop.f32.mrf.mxu3 }
 0x1dc   :  { %v697_v19 = vmax.f32 %v622_v15, 0.0 }
 0x1dd   :  { %v537_v24 = vpop.f32.mrf.mxu1 }
 0x1de   :  { %663 = vmatmul.bf16.gmra.mxu2 %v1873_v17  ;;  %v727_v27 = vpack.c.bf16 %v697_v19, %v696_v18  ;;  %v538_v45 = vadd.f32 %v1846_v41, %v537_v24 }
 0x1e0   :  { %819 = vmatmul.bf16.gmra.mxu3 %v727_v27 }
 0x1e1   :  { %v624_v29 = vpop.f32.mrf.mxu2 }
 0x1e2   :  { %v625_v46 = vadd.f32 %v624_v29, %v536_v32 }
 0x1e3   :  { %v1885_v42 = vpop.f32.mrf.mxu3 }
 0x1e4   :  { %v698_v53 = vmax.f32 %v625_v46, 0.0 }
 0x1e5   :  { %v540_v33 = vpop.f32.mrf.mxu1 }
 0x1e6   :  { %v541_v0 = vadd.f32 %v1846_v41, %v540_v33 }
 0x1e9   :  { %v626_v47 = vpop.f32.mrf.mxu2 }
 0x1ea   :  { %v627_v50 = vadd.f32 %v626_v47, %v538_v45  ;;  %v1333_v45 = vld [vmem:[%s2183_s0 + $0xd8] sm:$0xf0] }
 0x1eb   :  { %v1891_v63 = vpop.f32.mrf.mxu3 }
 0x1ec   :  { %v699_v54 = vmax.f32 %v627_v50, 0.0 }
 0x1ed   :  { %v542_v55 = vpop.f32.mrf.mxu1 }
 0x1ee   :  { %668 = vmatmul.bf16.gmra.mxu2 %v1888_v51  ;;  %v728_v60 = vpack.c.bf16 %v699_v54, %v698_v53  ;;  %v543_v7 = vadd.f32 %v1846_v41, %v542_v55  ;;  %v1916_v54 = vor.u32 %v1435_v38, %v1333_v45 }
 0x1f0   :  { %824 = vmatmul.bf16.gmra.mxu3 %v728_v60 }
 0x1f1   :  { %v629_v62 = vpop.f32.mrf.mxu2 }
 0x1f2   :  { %v630_v8 = vadd.f32 %v629_v62, %v541_v0 }
 0x1f3   :  { %v1903_v15 = vpop.f32.mrf.mxu3 }
 0x1f4   :  { %v700_v18 = vmax.f32 %v630_v8, 0.0  ;;  %v1437_v8 = vld [vmem:[%s2183_s0 + $0xe4] sm:$0xf] }
 0x1f5   :  { %v545_v1 = vpop.f32.mrf.mxu1 }
 0x1f6   :  { %v546_v32 = vadd.f32 %v1846_v41, %v545_v1 }
 0x1f9   :  { %v631_v9 = vpop.f32.mrf.mxu2 }
 0x1fa   :  { %v632_v13 = vadd.f32 %v631_v9, %v543_v7  ;;  %v1341_v9 = vld [vmem:[%s2183_s0 + $0xe8] sm:$0xf0] }
 0x1fb   :  { %v1907_v35 = vpop.f32.mrf.mxu3 }
 0x1fc   :  { %v701_v19 = vmax.f32 %v632_v13, 0.0 }
 0x1fd   :  { %v547_v24 = vpop.f32.mrf.mxu1 }
 0x1fe   :  { %673 = vmatmul.bf16.gmra.mxu2 %v1901_v14  ;;  %v729_v27 = vpack.c.bf16 %v701_v19, %v700_v18  ;;  %v548_v46 = vadd.f32 %v1846_v41, %v547_v24 }
 0x200   :  { %829 = vmatmul.bf16.gmra.mxu3 %v729_v27 }
 0x201   :  { %v634_v29 = vpop.f32.mrf.mxu2 }
 0x202   :  { %v635_v47 = vadd.f32 %v634_v29, %v546_v32  ;;  %v1931_v29 = vor.u32 %v1437_v8, %v1341_v9 }
 0x203   :  { %v1919_v1 = vpop.f32.mrf.mxu3 }
 0x204   :  { %v702_v55 = vmax.f32 %v635_v47, 0.0 }
 0x205   :  { %v550_v33 = vpop.f32.mrf.mxu1 }
 0x206   :  { %v551_v6 = vadd.f32 %v1846_v41, %v550_v33 }
 0x209   :  { %v636_v50 = vpop.f32.mrf.mxu2 }
 0x20a   :  { %v637_v53 = vadd.f32 %v636_v50, %v548_v46 }
 0x20b   :  { %v1929_v24 = vpop.f32.mrf.mxu3 }
 0x20c   :  { %v703_v60 = vmax.f32 %v637_v53, 0.0  ;;  %v1439_v53 = vld [vmem:[%s2183_s0 + $0xf4] sm:$0xf] }
 0x20d   :  { %v552_v62 = vpop.f32.mrf.mxu1 }
 0x20e   :  { %v730_v0 = vpack.c.bf16 %v703_v60, %v702_v55  ;;  %678 = vmatmul.bf16.gmra.mxu2 %v1916_v54  ;;  %v553_v13 = vadd.f32 %v1846_v41, %v552_v62  ;;  %v1349_v55 = vld [vmem:[%s2183_s0 + $0xf8] sm:$0xf0] }
 0x210   :  { %834 = vmatmul.bf16.gmra.mxu3 %v730_v0 }
 0x211   :  { %v639_v3 = vpop.f32.mrf.mxu2 }
 0x212   :  { %v640_v18 = vadd.f32 %v639_v3, %v551_v6  ;;  %v1944_v6 = vor.u32 %v1439_v53, %v1349_v55 }
 0x213   :  { %v1934_v47 = vpop.f32.mrf.mxu3 }
 0x214   :  { %v704_v32 = vmax.f32 %v640_v18, 0.0 }
 0x215   :  { %v555_v7 = vpop.f32.mrf.mxu1 }
 0x216   :  { %v556_v50 = vadd.f32 %v1846_v41, %v555_v7 }
 0x219   :  { %v641_v19 = vpop.f32.mrf.mxu2 }
 0x21a   :  { %v642_v27 = vadd.f32 %v641_v19, %v553_v13 }
 0x21b   :  { %v1946_v18 = vpop.f32.mrf.mxu3 }
 0x21c   :  { %v705_v33 = vmax.f32 %v642_v27, 0.0 }
 0x21d   :  { %v557_v45 = vpop.f32.mrf.mxu1 }
 0x21e   :  { %v731_v38 = vpack.c.bf16 %v705_v33, %v704_v32  ;;  %683 = vmatmul.bf16.gmra.mxu2 %v1931_v29  ;;  %v558_v60 = vadd.f32 %v1846_v41, %v557_v45 }
 0x220   :  { %839 = vmatmul.bf16.gmra.mxu3 %v731_v38 }
 0x221   :  { %v644_v46 = vpop.f32.mrf.mxu2 }
 0x222   :  { %v645_v62 = vadd.f32 %v644_v46, %v556_v50 }
 0x223   :  { %v1950_v33 = vpop.f32.mrf.mxu3 }
 0x224   :  { %v706_v9 = vmax.f32 %v645_v62, 0.0 }
 0x225   :  { %v560_v8 = vpop.f32.mrf.mxu1 }
 0x226   :  { %v561_v27 = vadd.f32 %v1846_v41, %v560_v8  ;;  %v568_v8 = vadd.f32 %v1846_v41, %v1848_v44 }
 0x229   :  { %v646_v0 = vpop.f32.mrf.mxu2 }
 0x22a   :  { %v647_v3 = vadd.f32 %v646_v0, %v558_v60 }
 0x22b   :  { %v1953_v62 = vpop.f32.mrf.mxu3 }
 0x22c   :  { %v707_v13 = vmax.f32 %v647_v3, 0.0  ;;  %v566_v3 = vadd.f32 %v1846_v41, %v1840_v37  ;;  %v573_v37 = vadd.f32 %v1846_v41, %v1863_v2  ;;  %v578_v2 = vadd.f32 %v1846_v41, %v1885_v42 }
 0x22d   :  { %v562_v32 = vpop.f32.mrf.mxu1  ;;  %v583_v42 = vadd.f32 %v1846_v41, %v1903_v15  ;;  %v588_v15 = vadd.f32 %v1846_v41, %v1919_v1 }
 0x22e   :  { %v732_v7 = vpack.c.bf16 %v707_v13, %v706_v9  ;;  %688 = vmatmul.bf16.gmra.mxu2 %v1944_v6  ;;  %v563_v38 = vadd.f32 %v1846_v41, %v562_v32 }
 0x230   :  { %844 = vmatmul.bf16.gmra.mxu3 %v732_v7 }
 0x231   :  { %v649_v19 = vpop.f32.mrf.mxu2 }
 0x232   :  { %v650_v45 = vadd.f32 %v649_v19, %v561_v27 }
 0x233   :  { %v1959_v32 = vpop.f32.mrf.mxu3 }
 0x234   :  { %v708_v53 = vmax.f32 %v650_v45, 0.0 }
 0x239   :  { %v651_v46 = vpop.f32.mrf.mxu2 }
 0x23a   :  { %v652_v50 = vadd.f32 %v651_v46, %v563_v38 }
 0x23c   :  { %v709_v55 = vmax.f32 %v652_v50, 0.0  ;;  %v571_v50 = vadd.f32 %v1846_v41, %v1860_v59  ;;  %v576_v59 = vadd.f32 %v1846_v41, %v1875_v26  ;;  %v581_v26 = vadd.f32 %v1846_v41, %v1891_v63 }
 0x23d   :  { %v586_v63 = vadd.f32 %v1846_v41, %v1907_v35  ;;  %v593_v35 = vadd.f32 %v1846_v41, %v1934_v47 }
 0x23e   :  { %v733_v60 = vpack.c.bf16 %v709_v55, %v708_v53 }
 0x240   :  { %849 = vmatmul.bf16.gmra.mxu3 %v733_v60 }
 0x241   :  { %v654_v0 = vpop.f32.mrf.mxu2 }
 0x242   :  { %v655_v9 = vadd.f32 %v654_v0, %v566_v3 }
 0x244   :  { %v710_v19 = vmax.f32 %v655_v9, 0.0 }
 0x249   :  { %v656_v13 = vpop.f32.mrf.mxu2 }
 0x24a   :  { %v657_v7 = vadd.f32 %v656_v13, %v568_v8 }
 0x24c   :  { %v711_v27 = vmax.f32 %v657_v7, 0.0 }
 0x24e   :  { %v734_v38 = vpack.c.bf16 %v711_v27, %v710_v19 }
 0x250   :  { %854 = vmatmul.bf16.gmra.mxu3 %v734_v38 }
 0x251   :  { %v659_v45 = vpop.f32.mrf.mxu2 }
 0x252   :  { %v660_v53 = vadd.f32 %v659_v45, %v571_v50 }
 0x253   :  { %v1961_v46 = vpop.f32.mrf.mxu3 }
 0x254   :  { %v712_v0 = vmax.f32 %v660_v53, 0.0 }
 0x259   :  { %v661_v44 = vpop.f32.mrf.mxu2 }
 0x25a   :  { %v662_v55 = vadd.f32 %v661_v44, %v573_v37 }
 0x25b   :  { %v1967_v60 = vpop.f32.mrf.mxu3 }
 0x25c   :  { %v713_v3 = vmax.f32 %v662_v55, 0.0 }
 0x25e   :  { %v735_v9 = vpack.c.bf16 %v713_v3, %v712_v0 }
 0x260   :  { %859 = vmatmul.bf16.gmra.mxu3 %v735_v9 }
 0x261   :  { %v664_v13 = vpop.f32.mrf.mxu2 }
 0x262   :  { %v665_v19 = vadd.f32 %v664_v13, %v576_v59 }
 0x263   :  { %v1971_v7 = vpop.f32.mrf.mxu3 }
 0x264   :  { %v714_v50 = vmax.f32 %v665_v19, 0.0 }
 0x269   :  { %v666_v27 = vpop.f32.mrf.mxu2 }
 0x26a   :  { %v667_v38 = vadd.f32 %v666_v27, %v578_v2 }
 0x26b   :  { %v1977_v45 = vpop.f32.mrf.mxu3 }
 0x26c   :  { %v715_v37 = vmax.f32 %v667_v38, 0.0 }
 0x26e   :  { %v736_v44 = vpack.c.bf16 %v715_v37, %v714_v50 }
 0x270   :  { %864 = vmatmul.bf16.gmra.mxu3 %v736_v44 }
 0x271   :  { %v669_v55 = vpop.f32.mrf.mxu2 }
 0x272   :  { %v670_v3 = vadd.f32 %v669_v55, %v581_v26 }
 0x273   :  { %v1981_v0 = vpop.f32.mrf.mxu3 }
 0x274   :  { %v716_v2 = vmax.f32 %v670_v3, 0.0 }
 0x279   :  { %v671_v9 = vpop.f32.mrf.mxu2 }
 0x27a   :  { %v672_v13 = vadd.f32 %v671_v9, %v583_v42 }
 0x27b   :  { %v1987_v59 = vpop.f32.mrf.mxu3 }
 0x27c   :  { %v717_v19 = vmax.f32 %v672_v13, 0.0 }
 0x27e   :  { %v737_v38 = vpack.c.bf16 %v717_v19, %v716_v2  ;;  %v591_v19 = vadd.f32 %v1846_v41, %v1929_v24 }
 0x280   :  { %869 = vmatmul.bf16.gmra.mxu3 %v737_v38 }
 0x281   :  { %v674_v50 = vpop.f32.mrf.mxu2 }
 0x282   :  { %v675_v44 = vadd.f32 %v674_v50, %v586_v63 }
 0x283   :  { %v830_v37 = vpop.f32.mrf.mxu3 }
 0x284   :  { %v718_v9 = vmax.f32 %v675_v44, 0.0 }
 0x289   :  { %v676_v55 = vpop.f32.mrf.mxu2 }
 0x28a   :  { %v677_v26 = vadd.f32 %v676_v55, %v588_v15 }
 0x28b   :  { %v832_v42 = vpop.f32.mrf.mxu3 }
 0x28c   :  { %v719_v3 = vmax.f32 %v677_v26, 0.0  ;;  %v898_v13 = vpack.c.bf16 %v832_v42, %v830_v37  ;;  %v598_v26 = vadd.f32 %v1846_v41, %v1950_v33 }
 0x28e   :  { %v738_v8 = vpack.c.bf16 %v719_v3, %v718_v9 }
 0x290   :  { %874 = vmatmul.bf16.gmra.mxu3 %v738_v8  ;;  %v596_v8 = vadd.f32 %v1846_v41, %v1946_v18 }
 0x291   :  { %v679_v53 = vpop.f32.mrf.mxu2 }
 0x292   :  { %v680_v38 = vadd.f32 %v679_v53, %v591_v19 }
 0x293   :  { %v835_v2 = vpop.f32.mrf.mxu3 }
 0x294   :  { %v720_v63 = vmax.f32 %v680_v38, 0.0  ;;  %v601_v38 = vadd.f32 %v1846_v41, %v1953_v62 }
 0x299   :  { %v681_v27 = vpop.f32.mrf.mxu2 }
 0x29a   :  { %v682_v1 = vadd.f32 %v681_v27, %v593_v35 }
 0x29b   :  { %v837_v50 = vpop.f32.mrf.mxu3 }
 0x29c   :  { %v721_v15 = vmax.f32 %v682_v1, 0.0  ;;  %v603_v1 = vadd.f32 %v1846_v41, %v1959_v32  ;;  %v899_v62 = vpack.c.bf16 %v837_v50, %v835_v2 }
 0x29e   :  { %v739_v55 = vpack.c.bf16 %v721_v15, %v720_v63 }
 0x2a0   :  { %879 = vmatmul.bf16.gmra.mxu3 %v739_v55 }
 0x2a1   :  { %v684_v44 = vpop.f32.mrf.mxu2 }
 0x2a2   :  { %v685_v24 = vadd.f32 %v684_v44, %v596_v8 }
 0x2a3   :  { %v840_v37 = vpop.f32.mrf.mxu3 }
 0x2a4   :  { %v722_v53 = vmax.f32 %v685_v24, 0.0 }
 0x2a9   :  { %v686_v42 = vpop.f32.mrf.mxu2 }
 0x2aa   :  { %v687_v9 = vadd.f32 %v686_v42, %v598_v26 }
 0x2ab   :  { %v842_v47 = vpop.f32.mrf.mxu3 }
 0x2ac   :  { %v723_v3 = vmax.f32 %v687_v9, 0.0 }
 0x2ae   :  { %v740_v27 = vpack.c.bf16 %v723_v3, %v722_v53  ;;  %v900_v3 = vpack.c.bf16 %v842_v47, %v840_v37 }
 0x2b0   :  { %884 = vmatmul.bf16.gmra.mxu3 %v740_v27  ;;  %v2188_v27 = vpack.c.bf16 %v1987_v59, %v1981_v0 }
 0x2b1   :  { %v689_v19 = vpop.f32.mrf.mxu2 }
 0x2b2   :  { %v690_v18 = vadd.f32 %v689_v19, %v601_v38  ;;  %v2189_v38 = vpack.c.bf16 %v1977_v45, %v1971_v7 }
 0x2b3   :  { %v845_v35 = vpop.f32.mrf.mxu3 }
 0x2b4   :  { %v724_v55 = vmax.f32 %v690_v18, 0.0 }
 0x2b9   :  { %v691_v63 = vpop.f32.mrf.mxu2 }
 0x2ba   :  { %v692_v15 = vadd.f32 %v691_v63, %v603_v1 }
 0x2bb   :  { %v847_v33 = vpop.f32.mrf.mxu3 }
 0x2bc   :  { %v725_v44 = vmax.f32 %v692_v15, 0.0  ;;  %v901_v9 = vpack.c.bf16 %v847_v33, %v845_v35  ;;  %v2190_v35 = vpack.c.bf16 %v1967_v60, %v1961_v46 }
 0x2be   :  { %v741_v8 = vpack.c.bf16 %v725_v44, %v724_v55 }
 0x2c0   :  { %889 = vmatmul.bf16.gmra.mxu3 %v741_v8 }
 0x2c3   :  { %v850_v26 = vpop.f32.mrf.mxu3 }
 0x2cb   :  { %v852_v24 = vpop.f32.mrf.mxu3 }
 0x2cc   :  { %v902_v42 = vpack.c.bf16 %v852_v24, %v850_v26 }
 0x2ce   :  { %915 = vmatpush.bf16.msrb.mxu0 %v902_v42 }
 0x2d2   :  { %916 = vmatpush.bf16.msrb.mxu0 %v901_v9 }
 0x2d3   :  { %v855_v53 = vpop.f32.mrf.mxu3 }
 0x2d6   :  { %917 = vmatpush.bf16.msrb.mxu0 %v900_v3 }
 0x2da   :  { %918 = vmatpush.bf16.msrb.mxu0 %v899_v62 }
 0x2db   :  { %v857_v41 = vpop.f32.mrf.mxu3 }
 0x2dc   :  { %v903_v32 = vpack.c.bf16 %v857_v41, %v855_v53 }
 0x2de   :  { %919 = vmatpush.bf16.msrb.mxu0 %v898_v13 }
 0x2e2   :  { %920 = vmatpush.bf16.msrb.mxu0 %v2188_v27 }
 0x2e3   :  { %v860_v19 = vpop.f32.mrf.mxu3 }
 0x2e6   :  { %921 = vmatpush.bf16.msrb.mxu0 %v2189_v38 }
 0x2ea   :  { %922 = vmatpush.bf16.msrb.mxu0 %v2190_v35 }
 0x2eb   :  { %v862_v37 = vpop.f32.mrf.mxu3 }
 0x2ec   :  { %v904_v47 = vpack.c.bf16 %v862_v37, %v860_v19 }
 0x2ed   :  { %923 = vmatmul.bf16.vlgmr.msrb.gmra.mxu0 %v1600_v10 }
 0x2f3   :  { %v865_v2 = vpop.f32.mrf.mxu3 }
 0x2fb   :  { %v867_v50 = vpop.f32.mrf.mxu3 }
 0x2fc   :  { %v905_v13 = vpack.c.bf16 %v867_v50, %v865_v2 }
 0x2fd   :  { %928 = vmatmul.bf16.gmra.mxu0 %v1631_v21 }
 0x303   :  { %v870_v0 = vpop.f32.mrf.mxu3 }
 0x30b   :  { %v872_v59 = vpop.f32.mrf.mxu3 }
 0x30c   :  { %v906_v1 = vpack.c.bf16 %v872_v59, %v870_v0 }
 0x30d   :  { %933 = vmatmul.bf16.gmra.mxu0 %v1658_v30 }
 0x313   :  { %v875_v7 = vpop.f32.mrf.mxu3 }
 0x31b   :  { %v877_v45 = vpop.f32.mrf.mxu3 }
 0x31c   :  { %v907_v55 = vpack.c.bf16 %v877_v45, %v875_v7 }
 0x31d   :  { %938 = vmatmul.bf16.gmra.mxu0 %v1685_v39 }
 0x323   :  { %v880_v46 = vpop.f32.mrf.mxu3 }
 0x32b   :  { %v882_v60 = vpop.f32.mrf.mxu3 }
 0x32c   :  { %v908_v30 = vpack.c.bf16 %v882_v60, %v880_v46 }
 0x32d   :  { %943 = vmatmul.bf16.gmra.mxu0 %v1712_v48 }
 0x333   :  { %v885_v18 = vpop.f32.mrf.mxu3 }
 0x33b   :  { %v887_v10 = vpop.f32.mrf.mxu3 }
 0x33c   :  { %v909_v33 = vpack.c.bf16 %v887_v10, %v885_v18 }
 0x33d   :  { %948 = vmatmul.bf16.gmra.mxu0 %v1739_v57 }
 0x343   :  { %v890_v63 = vpop.f32.mrf.mxu3 }
 0x34b   :  { %v892_v15 = vpop.f32.mrf.mxu3 }
 0x34c   :  { %v910_v21 = vpack.c.bf16 %v892_v15, %v890_v63 }
 0x34d   :  { %953 = vmatmul.bf16.gmra.mxu0 %v1772_v4 }
 0x34e   :  { %1004 = vmatpush.bf16.msrb.mxu1 %v910_v21 }
 0x352   :  { %1005 = vmatpush.bf16.msrb.mxu1 %v909_v33 }
 0x356   :  { %1006 = vmatpush.bf16.msrb.mxu1 %v908_v30 }
 0x35a   :  { %1007 = vmatpush.bf16.msrb.mxu1 %v907_v55 }
 0x35d   :  { %958 = vmatmul.bf16.gmra.mxu0 %v1811_v20 }
 0x35e   :  { %1008 = vmatpush.bf16.msrb.mxu1 %v906_v1 }
 0x362   :  { %1009 = vmatpush.bf16.msrb.mxu1 %v905_v13 }
 0x366   :  { %1010 = vmatpush.bf16.msrb.mxu1 %v904_v47 }
 0x36a   :  { %1011 = vmatpush.bf16.msrb.mxu1 %v903_v32  ;;  %v924_v39 = vpop.f32.mrf.mxu0 }
 0x36d   :  { %1012 = vmatmul.bf16.vlgmr.msrb.gmra.mxu1 %v1616_v16  ;;  %963 = vmatmul.bf16.gmra.mxu0 %v1602_v11 }
 0x372   :  { %v926_v16 = vpop.f32.mrf.mxu0 }
 0x37a   :  { %v929_v11 = vpop.f32.mrf.mxu0 }
 0x37d   :  { %1017 = vmatmul.bf16.gmra.mxu1 %v1643_v25  ;;  %968 = vmatmul.bf16.gmra.mxu0 %v1633_v22 }
 0x382   :  { %v931_v22 = vpop.f32.mrf.mxu0 }
 0x38a   :  { %v934_v25 = vpop.f32.mrf.mxu0 }
 0x38d   :  { %1022 = vmatmul.bf16.gmra.mxu1 %v1670_v34  ;;  %973 = vmatmul.bf16.gmra.mxu0 %v1660_v31  ;;  %v2041_v31 = vld [vmem:[%s2186_s5] ss:$0 sm:$0xff] }
 0x38e   :  { %v925_v34 = vadd.f32 %v2041_v31, %v924_v39  ;;  %v935_v8 = vadd.f32 %v2041_v31, %v934_v25 }
 0x39d   :  { %1027 = vmatmul.bf16.gmra.mxu1 %v1697_v43  ;;  %978 = vmatmul.bf16.gmra.mxu0 %v1687_v40  ;;  %v936_v40 = vpop.f32.mrf.mxu0 }
 0x39e   :  { %v937_v42 = vadd.f32 %v2041_v31, %v936_v40 }
 0x3ad   :  { %1032 = vmatmul.bf16.gmra.mxu1 %v1724_v52  ;;  %983 = vmatmul.bf16.gmra.mxu0 %v1714_v49  ;;  %v939_v49 = vpop.f32.mrf.mxu0  ;;  %v927_v52 = vadd.f32 %v2041_v31, %v926_v16 }
 0x3ae   :  { %v940_v3 = vadd.f32 %v2041_v31, %v939_v49 }
 0x3b5   :  { %v941_v4 = vpop.f32.mrf.mxu0 }
 0x3b6   :  { %v942_v27 = vadd.f32 %v2041_v31, %v941_v4 }
 0x3bd   :  { %1037 = vmatmul.bf16.gmra.mxu1 %v1751_v61  ;;  %988 = vmatmul.bf16.gmra.mxu0 %v1741_v58  ;;  %v930_v61 = vadd.f32 %v2041_v31, %v929_v11  ;;  %v944_v20 = vpop.f32.mrf.mxu0 }
 0x3be   :  { %v945_v35 = vadd.f32 %v2041_v31, %v944_v20 }
 0x3cd   :  { %1042 = vmatmul.bf16.gmra.mxu1 %v1790_v12  ;;  %993 = vmatmul.bf16.gmra.mxu0 %v1774_v5 }
 0x3dd   :  { %1047 = vmatmul.bf16.gmra.mxu1 %v1826_v28  ;;  %998 = vmatmul.bf16.gmra.mxu0 %v1813_v23  ;;  %v932_v28 = vadd.f32 %v2041_v31, %v931_v22  ;;  %v946_v23 = vpop.f32.mrf.mxu0 }
 0x3ea   :  { %v1013_v43 = vpop.f32.mrf.mxu1 }
 0x3eb   :  { %v1014_v48 = vadd.f32 %v1013_v43, %v925_v34 }
 0x3ed   :  { %1093 = vst [vmem:[%s2187_s6] sm:$0xff] %v1014_v48  ;;  %1052 = vmatmul.bf16.gmra.mxu1 %v1838_v36 }
 0x3f2   :  { %v1015_v57 = vpop.f32.mrf.mxu1 }
 0x3f3   :  { %v1016_v58 = vadd.f32 %v1015_v57, %v927_v52 }
 0x3f5   :  { %1094 = vst [vmem:[%s2187_s6 + $0x8] sm:$0xff] %v1016_v58 }
 0x3fa   :  { %v1018_v5 = vpop.f32.mrf.mxu1 }
 0x3fb   :  { %v1019_v12 = vadd.f32 %v1018_v5, %v930_v61 }
 0x3fd   :  { %1095 = vst [vmem:[%s2187_s6 + $0x10] sm:$0xff] %v1019_v12  ;;  %1057 = vmatmul.bf16.gmra.mxu1 %v1858_v56  ;;  %v949_v56 = vpop.f32.mrf.mxu0 }
 0x3fe   :  { %v950_v59 = vadd.f32 %v2041_v31, %v949_v56 }
 0x402   :  { %v1020_v36 = vpop.f32.mrf.mxu1 }
 0x403   :  { %v1021_v44 = vadd.f32 %v1020_v36, %v932_v28 }
 0x405   :  { %1096 = vst [vmem:[%s2187_s6 + $0x18] sm:$0xff] %v1021_v44  ;;  %v951_v62 = vpop.f32.mrf.mxu0 }
 0x406   :  { %v952_v45 = vadd.f32 %v2041_v31, %v951_v62 }
 0x40a   :  { %v1023_v26 = vpop.f32.mrf.mxu1 }
 0x40b   :  { %v1024_v24 = vadd.f32 %v1023_v26, %v935_v8 }
 0x40d   :  { %1097 = vst [vmem:[%s2187_s6 + $0x20] sm:$0xff] %v1024_v24  ;;  %1062 = vmatmul.bf16.gmra.mxu1 %v1873_v17  ;;  %v954_v17 = vpop.f32.mrf.mxu0 }
 0x40e   :  { %v955_v18 = vadd.f32 %v2041_v31, %v954_v17 }
 0x412   :  { %v1025_v9 = vpop.f32.mrf.mxu1 }
 0x413   :  { %v1026_v53 = vadd.f32 %v1025_v9, %v937_v42 }
 0x415   :  { %1098 = vst [vmem:[%s2187_s6 + $0x28] sm:$0xff] %v1026_v53  ;;  %v956_v47 = vpop.f32.mrf.mxu0 }
 0x41a   :  { %v1028_v41 = vpop.f32.mrf.mxu1 }
 0x41b   :  { %v1029_v32 = vadd.f32 %v1028_v41, %v940_v3 }
 0x41d   :  { %1099 = vst [vmem:[%s2187_s6 + $0x30] sm:$0xff] %v1029_v32  ;;  %1067 = vmatmul.bf16.gmra.mxu1 %v1888_v51  ;;  %v947_v51 = vadd.f32 %v2041_v31, %v946_v23  ;;  %v959_v0 = vpop.f32.mrf.mxu0 }
 0x41e   :  { %v960_v55 = vadd.f32 %v2041_v31, %v959_v0 }
 0x422   :  { %v1030_v19 = vpop.f32.mrf.mxu1 }
 0x423   :  { %v1031_v38 = vadd.f32 %v1030_v19, %v942_v27 }
 0x425   :  { %1100 = vst [vmem:[%s2187_s6 + $0x38] sm:$0xff] %v1031_v38 }
 0x42a   :  { %v1033_v37 = vpop.f32.mrf.mxu1 }
 0x42b   :  { %v1034_v2 = vadd.f32 %v1033_v37, %v945_v35 }
 0x42d   :  { %1101 = vst [vmem:[%s2187_s6 + $0x40] sm:$0xff] %v1034_v2  ;;  %1072 = vmatmul.bf16.gmra.mxu1 %v1901_v14  ;;  %v961_v14 = vpop.f32.mrf.mxu0 }
 0x432   :  { %v1035_v50 = vpop.f32.mrf.mxu1 }
 0x433   :  { %v1036_v13 = vadd.f32 %v1035_v50, %v947_v51 }
 0x435   :  { %1102 = vst [vmem:[%s2187_s6 + $0x48] sm:$0xff] %v1036_v13  ;;  %v964_v10 = vpop.f32.mrf.mxu0 }
 0x436   :  { %v965_v40 = vadd.f32 %v2041_v31, %v964_v10 }
 0x43a   :  { %v1038_v1 = vpop.f32.mrf.mxu1 }
 0x43b   :  { %v1039_v7 = vadd.f32 %v1038_v1, %v950_v59 }
 0x43d   :  { %1103 = vst [vmem:[%s2187_s6 + $0x50] sm:$0xff] %v1039_v7  ;;  %1077 = vmatmul.bf16.gmra.mxu1 %v1916_v54  ;;  %v957_v54 = vadd.f32 %v2041_v31, %v956_v47  ;;  %v966_v33 = vpop.f32.mrf.mxu0 }
 0x442   :  { %v1040_v46 = vpop.f32.mrf.mxu1 }
 0x443   :  { %v1041_v60 = vadd.f32 %v1040_v46, %v952_v45 }
 0x445   :  { %1104 = vst [vmem:[%s2187_s6 + $0x58] sm:$0xff] %v1041_v60  ;;  %v969_v11 = vpop.f32.mrf.mxu0 }
 0x446   :  { %v970_v58 = vadd.f32 %v2041_v31, %v969_v11 }
 0x44a   :  { %v1043_v63 = vpop.f32.mrf.mxu1 }
 0x44b   :  { %v1044_v15 = vadd.f32 %v1043_v63, %v955_v18 }
 0x44d   :  { %1105 = vst [vmem:[%s2187_s6 + $0x60] sm:$0xff] %v1044_v15  ;;  %1082 = vmatmul.bf16.gmra.mxu1 %v1931_v29  ;;  %v962_v29 = vadd.f32 %v2041_v31, %v961_v14  ;;  %v971_v34 = vpop.f32.mrf.mxu0 }
 0x44e   :  { %v972_v12 = vadd.f32 %v2041_v31, %v971_v34 }
 0x452   :  { %v1045_v21 = vpop.f32.mrf.mxu1 }
 0x453   :  { %v1046_v30 = vadd.f32 %v1045_v21, %v957_v54 }
 0x455   :  { %1106 = vst [vmem:[%s2187_s6 + $0x68] sm:$0xff] %v1046_v30  ;;  %v974_v49 = vpop.f32.mrf.mxu0 }
 0x456   :  { %v975_v44 = vadd.f32 %v2041_v31, %v974_v49 }
 0x45a   :  { %v1048_v39 = vpop.f32.mrf.mxu1 }
 0x45b   :  { %v1049_v16 = vadd.f32 %v1048_v39, %v960_v55 }
 0x45d   :  { %1107 = vst [vmem:[%s2187_s6 + $0x70] sm:$0xff] %v1049_v16  ;;  %1087 = vmatmul.bf16.gmra.mxu1 %v1944_v6  ;;  %v967_v6 = vadd.f32 %v2041_v31, %v966_v33  ;;  %v976_v4 = vpop.f32.mrf.mxu0 }
 0x45e   :  { %v977_v24 = vadd.f32 %v2041_v31, %v976_v4 }
 0x462   :  { %v1050_v22 = vpop.f32.mrf.mxu1 }
 0x463   :  { %v1051_v25 = vadd.f32 %v1050_v22, %v962_v29 }
 0x465   :  { %1108 = vst [vmem:[%s2187_s6 + $0x78] sm:$0xff] %v1051_v25  ;;  %v979_v36 = vpop.f32.mrf.mxu0 }
 0x466   :  { %v980_v9 = vadd.f32 %v2041_v31, %v979_v36 }
 0x46a   :  { %v1053_v43 = vpop.f32.mrf.mxu1 }
 0x46b   :  { %v1054_v48 = vadd.f32 %v1053_v43, %v965_v40 }
 0x46d   :  { %1109 = vst [vmem:[%s2187_s6 + $0x80] sm:$0xff] %v1054_v48  ;;  %v981_v26 = vpop.f32.mrf.mxu0 }
 0x46e   :  { %v982_v41 = vadd.f32 %v2041_v31, %v981_v26 }
 0x472   :  { %v1055_v52 = vpop.f32.mrf.mxu1 }
 0x473   :  { %v1056_v57 = vadd.f32 %v1055_v52, %v967_v6 }
 0x475   :  { %1110 = vst [vmem:[%s2187_s6 + $0x88] sm:$0xff] %v1056_v57  ;;  %v984_v53 = vpop.f32.mrf.mxu0 }
 0x476   :  { %v985_v19 = vadd.f32 %v2041_v31, %v984_v53 }
 0x47a   :  { %v1058_v61 = vpop.f32.mrf.mxu1 }
 0x47b   :  { %v1059_v5 = vadd.f32 %v1058_v61, %v970_v58 }
 0x47d   :  { %1111 = vst [vmem:[%s2187_s6 + $0x90] sm:$0xff] %v1059_v5  ;;  %v986_v17 = vpop.f32.mrf.mxu0 }
 0x47e   :  { %v987_v47 = vadd.f32 %v2041_v31, %v986_v17 }
 0x482   :  { %v1060_v20 = vpop.f32.mrf.mxu1 }
 0x483   :  { %v1061_v28 = vadd.f32 %v1060_v20, %v972_v12 }
 0x485   :  { %1112 = vst [vmem:[%s2187_s6 + $0x98] sm:$0xff] %v1061_v28  ;;  %v989_v37 = vpop.f32.mrf.mxu0 }
 0x486   :  { %v990_v13 = vadd.f32 %v2041_v31, %v989_v37 }
 0x48a   :  { %v1063_v8 = vpop.f32.mrf.mxu1 }
 0x48b   :  { %v1064_v23 = vadd.f32 %v1063_v8, %v975_v44 }
 0x48d   :  { %1113 = vst [vmem:[%s2187_s6 + $0xa0] sm:$0xff] %v1064_v23  ;;  %v991_v50 = vpop.f32.mrf.mxu0 }
 0x48e   :  { %v992_v7 = vadd.f32 %v2041_v31, %v991_v50 }
 0x492   :  { %v1065_v56 = vpop.f32.mrf.mxu1 }
 0x493   :  { %v1066_v42 = vadd.f32 %v1065_v56, %v977_v24 }
 0x495   :  { %1114 = vst [vmem:[%s2187_s6 + $0xa8] sm:$0xff] %v1066_v42  ;;  %v994_v1 = vpop.f32.mrf.mxu0 }
 0x496   :  { %v995_v46 = vadd.f32 %v2041_v31, %v994_v1 }
 0x49a   :  { %v1068_v3 = vpop.f32.mrf.mxu1 }
 0x49b   :  { %v1069_v62 = vadd.f32 %v1068_v3, %v980_v9 }
 0x49d   :  { %1115 = vst [vmem:[%s2187_s6 + $0xb0] sm:$0xff] %v1069_v62  ;;  %v996_v18 = vpop.f32.mrf.mxu0 }
 0x49e   :  { %v997_v63 = vadd.f32 %v2041_v31, %v996_v18 }
 0x4a2   :  { %v1070_v32 = vpop.f32.mrf.mxu1 }
 0x4a3   :  { %v1071_v27 = vadd.f32 %v1070_v32, %v982_v41 }
 0x4a5   :  { %1116 = vst [vmem:[%s2187_s6 + $0xb8] sm:$0xff] %v1071_v27  ;;  %v999_v21 = vpop.f32.mrf.mxu0 }
 0x4a6   :  { %v1000_v33 = vadd.f32 %v2041_v31, %v999_v21 }
 0x4aa   :  { %v1073_v38 = vpop.f32.mrf.mxu1 }
 0x4ab   :  { %v1074_v35 = vadd.f32 %v1073_v38, %v985_v19 }
 0x4ad   :  { %1117 = vst [vmem:[%s2187_s6 + $0xc0] sm:$0xff] %v1074_v35  ;;  %v1001_v39 = vpop.f32.mrf.mxu0 }
 0x4ae   :  { %v1002_v16 = vadd.f32 %v2041_v31, %v1001_v39 }
 0x4b2   :  { %v1075_v2 = vpop.f32.mrf.mxu1 }
 0x4b3   :  { %v1076_v51 = vadd.f32 %v1075_v2, %v987_v47 }
 0x4b5   :  { %1118 = vst [vmem:[%s2187_s6 + $0xc8] sm:$0xff] %v1076_v51 }
 0x4ba   :  { %v1078_v0 = vpop.f32.mrf.mxu1 }
 0x4bb   :  { %v1079_v59 = vadd.f32 %v1078_v0, %v990_v13 }
 0x4bd   :  { %1119 = vst [vmem:[%s2187_s6 + $0xd0] sm:$0xff] %v1079_v59 }
 0x4c2   :  { %v1080_v14 = vpop.f32.mrf.mxu1 }
 0x4c3   :  { %v1081_v45 = vadd.f32 %v1080_v14, %v992_v7 }
 0x4c5   :  { %1120 = vst [vmem:[%s2187_s6 + $0xd8] sm:$0xff] %v1081_v45 }
 0x4ca   :  { %v1083_v60 = vpop.f32.mrf.mxu1 }
 0x4cb   :  { %v1084_v10 = vadd.f32 %v1083_v60, %v995_v46 }
 0x4cd   :  { %1121 = vst [vmem:[%s2187_s6 + $0xe0] sm:$0xff] %v1084_v10 }
 0x4d2   :  { %v1085_v15 = vpop.f32.mrf.mxu1 }
 0x4d3   :  { %v1086_v54 = vadd.f32 %v1085_v15, %v997_v63 }
 0x4d5   :  { %1122 = vst [vmem:[%s2187_s6 + $0xe8] sm:$0xff] %v1086_v54 }
 0x4da   :  { %v1088_v30 = vpop.f32.mrf.mxu1 }
 0x4db   :  { %v1089_v55 = vadd.f32 %v1088_v30, %v1000_v33 }
 0x4dd   :  { %1123 = vst [vmem:[%s2187_s6 + $0xf0] sm:$0xff] %v1089_v55 }
 0x4e2   :  { %v1090_v11 = vpop.f32.mrf.mxu1 }
 0x4e3   :  { %v1091_v29 = vadd.f32 %v1090_v11, %v1002_v16 }
 0x4e5   :  { %1124 = vst [vmem:[%s2187_s6 + $0xf8] sm:$0xff] %v1091_v29 }

</bundles_post_ra>
